<compile_context>
chip_gen: v7x
topology: tpu7x:2x2x1
jax: 0.10.0
libtpu: 0.0.40
codegen_flags: <defaults>
</compile_context>

<pallas_src>
import functools

import jax
import jax.numpy as jnp
import numpy as np
from jax.experimental import pallas as pl
from jax.experimental.pallas import tpu as pltpu


def _norm_stats_kernel(x_ref, alpha_ref, num_ref, mn_ref, inv_ref, *, eps, feat):
    """Phase 1: per-row min + inv(std+eps) and the row-contracted matmul partial."""
    @pl.when(pl.program_id(1) == 0)
    def _init():
        num_ref[...] = jnp.zeros_like(num_ref)

    x_nat = x_ref[...]                                   # (tm, F) native dtype (f32 / bf16)
    xf = x_nat.astype(jnp.float32)                       # stats computed in f32

    # Row statistics over the resident tile (lane-axis reductions).
    mn = jnp.min(xf, axis=-1, keepdims=True)             # (tm, 1)  "mean" = min (reference quirk)
    mean = jnp.sum(xf, axis=-1, keepdims=True) * (1.0 / feat)
    centered = xf - mean                                  # two-pass variance: stable
    var = jnp.sum(centered * centered, axis=-1, keepdims=True) * (1.0 / (feat - 1))
    std = jnp.sqrt(var)

    mn_ref[...] = mn
    inv_ref[...] = 1.0 / (std + eps)                      # exact reciprocal; only tm values

    # alpha @ (x - mn) == alpha @ x - sum(alpha * mn):  the MXU eats the native-dtype
    # tile directly (no (tm, F) f32 temporary on the matmul path); the scalar
    # correction is applied in the wrapper from the `mn` output.
    a_nat = alpha_ref[...].astype(x_nat.dtype)            # (1, tm)
    part = jnp.dot(a_nat, x_nat, preferred_element_type=jnp.float32)   # (1, F)
    num_ref[...] += part[None]                            # (1, 1, F) per-core accumulator


def _norm_write_kernel(num_ref, inv_ref, bias_ref, o_ref):
    """Phase 2: out[i, :] = num * inv[i] + bias   (x is not re-read)."""
    o_ref[...] = (num_ref[...] * inv_ref[...] + bias_ref[...]).astype(o_ref.dtype)


def _vmem_budget_and_limit():
    """Generation-aware (per-step working-set budget, scoped-VMEM limit) in bytes."""
    try:
        cap = int(getattr(pltpu.get_tpu_info(), "vmem_capacity_bytes", 0)) or (64 << 20)
    except Exception:  # non-TPU / interpret fallbacks stay conservative
        cap = 64 << 20
    # v7x (64 MiB physical) -> 16 MiB working set / 32 MiB scoped limit;
    # v5e/v6e (128 MiB)     -> 32 MiB working set / 64 MiB scoped limit.
    budget = min(max(cap // 4, 4 << 20), 32 << 20)
    limit = min(max(cap // 2, 32 << 20), 64 << 20)
    return budget, limit


def _pick_row_tile(s, f, itemsize, budget):
    """Largest (8,128)-friendly row tile dividing S whose *real* per-step footprint
    (double-buffered native x block + f32 upcast + centered temp) fits `budget`."""
    per_row = f * (2 * itemsize + 12)      # 2 pipeline buffers + ~3 f32 words/elem of temps
    tm_max = max(budget // per_row, 1)
    if tm_max >= s or s % 128 != 0:
        return s                            # single block: block shape == full array dims
    tm = (min(tm_max, s) // 128) * 128
    while tm >= 128 and s % tm != 0:
        tm -= 128
    return tm if tm >= 128 else 128


def encoder_forward(x, mask, alpha, bias, *, eps=1e-6, row_tile=None):
    """Encoder with an empty layer stack: output = LayerNormalization(x)."""
    del mask  # unused: self.layers is empty
    s, f = x.shape
    assert s == f, "`alpha @ (x - mean)` in the reference requires seq == features"

    itemsize = jnp.dtype(x.dtype).itemsize
    budget, vmem_limit = _vmem_budget_and_limit()
    tm = row_tile if row_tile is not None else _pick_row_tile(s, f, itemsize, budget)
    assert s % tm == 0
    n_tiles = s // tm

    # Split phase-1 row tiles across (up to) two TensorCores via a leading
    # "parallel" axis; each core owns its own partial numerator (v7x megacore;
    # harmless-by-default on single-TC v5e/v6e).
    ncs = 2 if (n_tiles >= 2 and n_tiles % 2 == 0) else 1
    tpc = n_tiles // ncs

    # alpha contracts over rows (length S == F); keep both params lane-major (1, F).
    alpha2d = alpha.reshape(1, s).astype(jnp.float32)
    bias2d = bias.reshape(1, f).astype(jnp.float32)

    # ---- Phase 1: stream x once -> per-core num partials, per-row min & inv. ----
    num_parts, mn, inv = pl.pallas_call(
        functools.partial(_norm_stats_kernel, eps=eps, feat=f),
        out_shape=(jax.ShapeDtypeStruct((ncs, 1, f), jnp.float32),
                   jax.ShapeDtypeStruct((s, 1), jnp.float32),
                   jax.ShapeDtypeStruct((s, 1), jnp.float32)),
        grid=(ncs, tpc),
        in_specs=[
            pl.BlockSpec((tm, f), lambda c, i: (c * tpc + i, 0)),    # x row tile (native dtype)
            pl.BlockSpec((1, tm), lambda c, i: (0, c * tpc + i)),    # matching alpha slice
        ],
        out_specs=(
            pl.BlockSpec((1, 1, f), lambda c, i: (c, 0, 0)),         # resident per-core partial
            pl.BlockSpec((tm, 1), lambda c, i: (c * tpc + i, 0)),    # per-row min
            pl.BlockSpec((tm, 1), lambda c, i: (c * tpc + i, 0)),    # per-row inv(std+eps)
        ),
        compiler_params=pltpu.CompilerParams(
            dimension_semantics=("parallel", "arbitrary"),           # cores x reduction
            vmem_limit_bytes=vmem_limit),
        cost_estimate=pl.CostEstimate(
            flops=6 * s * f, transcendentals=s,
            bytes_accessed=s * f * itemsize + 3 * s * 4 + f * 4),
    )(x, alpha2d)

    # Tiny combine in plain JAX (a few KB):
    #   alpha @ (x - mn) == alpha @ x - sum(alpha * mn).
    corr = jnp.sum(alpha2d * mn.reshape(1, s))
    num = num_parts.reshape(ncs, f).sum(axis=0, keepdims=True) - corr   # (1, F) f32

    # ---- Phase 2: lane-dense writeback, fully parallel over row tiles. ----
    return pl.pallas_call(
        _norm_write_kernel,
        out_shape=jax.ShapeDtypeStruct((s, f), x.dtype),
        grid=(n_tiles,),
        in_specs=[
            pl.BlockSpec((1, f), lambda i: (0, 0)),
            pl.BlockSpec((tm, 1), lambda i: (i, 0)),
            pl.BlockSpec((1, f), lambda i: (0, 0)),
        ],
        out_specs=pl.BlockSpec((tm, f), lambda i: (i, 0)),
        compiler_params=pltpu.CompilerParams(
            dimension_semantics=("parallel",),                       # megacore on v7x
            vmem_limit_bytes=vmem_limit),
        cost_estimate=pl.CostEstimate(
            flops=2 * s * f, transcendentals=0,
            bytes_accessed=s * f * itemsize + 2 * f * 4 + s * 4),
    )(num, inv, bias2d)


def encoder_forward_ref(x, alpha, bias, *, eps=1e-6):
    """Plain-JAX reference matching the (quirky) PyTorch semantics."""
    x = x.astype(jnp.float32)
    mn = jnp.min(x, axis=-1, keepdims=True)
    std = jnp.std(x, axis=-1, keepdims=True, ddof=1)
    num = alpha.astype(jnp.float32) @ (x - mn)           # (F,) @ (S, F) -> (F,)
    return num / (std + eps) + bias.astype(jnp.float32)


if __name__ == "__main__":
    key = jax.random.PRNGKey(0)
    kx, ka, kb = jax.random.split(key, 3)

    # Lane-dense shape: S == F is forced by the '@'; last dim a multiple of 128.
    S = F = 128
    x = jax.random.normal(kx, (S, F), dtype=jnp.float32)
    mask = jnp.ones((1, S, S), dtype=jnp.float32)        # accepted, unused (empty layer stack)

    # Parameters exactly as in LayerNormalization.__init__ (deterministic).
    alpha = jnp.ones((F,), dtype=jnp.float32)
    bias = jnp.zeros((F,), dtype=jnp.float32)

    out = jax.block_until_ready(encoder_forward(x, mask, alpha, bias))
    ref = encoder_forward_ref(x, alpha, bias)
    np.testing.assert_allclose(np.asarray(out), np.asarray(ref), rtol=5e-3, atol=5e-3)

    # Non-trivial parameters.
    alpha_r = jax.random.normal(ka, (F,), dtype=jnp.float32)
    bias_r = jax.random.normal(kb, (F,), dtype=jnp.float32)
    out_r = jax.block_until_ready(encoder_forward(x, mask, alpha_r, bias_r))
    ref_r = encoder_forward_ref(x, alpha_r, bias_r)
    np.testing.assert_allclose(np.asarray(out_r), np.asarray(ref_r), rtol=5e-3, atol=5e-3)

    # Native bf16 input path (no wrapper upcast; MXU consumes bf16; output stays bf16).
    x_bf16 = x.astype(jnp.bfloat16)
    out_bf = jax.block_until_ready(encoder_forward(x_bf16, mask, alpha, bias))
    ref_bf = encoder_forward_ref(x_bf16.astype(jnp.float32), alpha, bias)
    np.testing.assert_allclose(np.asarray(out_bf.astype(jnp.float32)),
                               np.asarray(ref_bf), rtol=3e-2, atol=3e-2)

    # Small non-(8,128)-aligned shape exercising the single-block fallback.
    S2 = F2 = 16
    x2 = jax.random.normal(kx, (S2, F2), dtype=jnp.float32)
    mask2 = jnp.ones((1, S2, S2), dtype=jnp.float32)
    a2 = jnp.ones((F2,), jnp.float32)
    b2 = jnp.zeros((F2,), jnp.float32)
    out2 = jax.block_until_ready(encoder_forward(x2, mask2, a2, b2))
    ref2 = encoder_forward_ref(x2, a2, b2)
    np.testing.assert_allclose(np.asarray(out2), np.asarray(ref2), rtol=5e-3, atol=5e-3)

    # Multi-tile path: 4 row tiles -> the two-core split (ncs=2) AND the per-core
    # cross-tile accumulation (pl.when-initialized resident block) are exercised.
    S3 = F3 = 512
    x3 = jax.random.normal(kb, (S3, F3), dtype=jnp.float32)
    mask3 = jnp.ones((1, S3, S3), dtype=jnp.float32)
    a3 = jax.random.normal(ka, (F3,), dtype=jnp.float32)
    b3 = jax.random.normal(kb, (F3,), dtype=jnp.float32)
    out3 = jax.block_until_ready(encoder_forward(x3, mask3, a3, b3, row_tile=128))
    ref3 = encoder_forward_ref(x3, a3, b3)
    np.testing.assert_allclose(np.asarray(out3), np.asarray(ref3), rtol=5e-3, atol=5e-3)

    print("KERNEL_OK")
</pallas_src>

<mosaic_0001>
module attributes {stable_mosaic.version = 11 : i64} {
  func.func @_norm_stats_kernel(%arg0: i32, %arg1: i32, %arg2: memref<128x128xf32, #tpu.memory_space<vmem>>, %arg3: memref<1x128xf32, #tpu.memory_space<vmem>>, %arg4: memref<1x1x128xf32, #tpu.memory_space<vmem>>, %arg5: memref<128x1xf32, #tpu.memory_space<vmem>>, %arg6: memref<128x1xf32, #tpu.memory_space<vmem>>) attributes {dimension_semantics = [#tpu.dimension_semantics<parallel>, #tpu.dimension_semantics<arbitrary>], iteration_bounds = array<i64: 1, 1>, scalar_prefetch = 0 : i64, scratch_operands = 0 : i64, tpu.core_type = #tpu.core_type<tc>, window_params = [{transform_indices = @transform_0, window_bounds = array<i64: 128, 128>}, {transform_indices = @transform_1, window_bounds = array<i64: 1, 128>}, {transform_indices = @transform_2, window_bounds = array<i64: 1, 1, 128>}, {transform_indices = @transform_3, window_bounds = array<i64: 128, 1>}, {transform_indices = @transform_4, window_bounds = array<i64: 128, 1>}]} {
    %c0_i32 = arith.constant 0 : i32
    %0 = arith.cmpi eq, %arg1, %c0_i32 : i32
    %1 = arith.extui %0 : i1 to i32
    %c0_i32_0 = arith.constant 0 : i32
    %2 = arith.cmpi ne, %1, %c0_i32_0 : i32
    scf.if %2 {
      %cst_21 = arith.constant 0.000000e+00 : f32
      %30 = vector.broadcast %cst_21 : f32 to vector<1x1x128xf32>
      %c0_22 = arith.constant 0 : index
      %c0_23 = arith.constant 0 : index
      %c0_24 = arith.constant 0 : index
      %31 = vector.load %arg4[%c0_22, %c0_23, %c0_24] : memref<1x1x128xf32, #tpu.memory_space<vmem>>, vector<1x1x128xf32>
      tpu.vector_store %arg4[%c0_22, %c0_23, %c0_24], %30 {strides = array<i32>} : memref<1x1x128xf32, #tpu.memory_space<vmem>>, vector<1x1x128xf32>,
    } else {
    }
    %c0 = arith.constant 0 : index
    %c0_1 = arith.constant 0 : index
    %3 = vector.load %arg2[%c0, %c0_1] : memref<128x128xf32, #tpu.memory_space<vmem>>, vector<128x128xf32>
    %cst = arith.constant dense<0x7F800000> : vector<128xf32>
    %4 = vector.multi_reduction <minimumf>, %3, %cst [1] : vector<128x128xf32> to vector<128xf32>
    %5 = vector.shape_cast %4 : vector<128xf32> to vector<128x1xf32>
    %cst_2 = arith.constant dense<0.000000e+00> : vector<128xf32>
    %6 = vector.multi_reduction <add>, %3, %cst_2 [1] : vector<128x128xf32> to vector<128xf32>
    %7 = vector.shape_cast %6 : vector<128xf32> to vector<128x1xf32>
    %cst_3 = arith.constant 7.812500e-03 : f32
    %8 = vector.broadcast %cst_3 : f32 to vector<128x1xf32>
    %9 = arith.mulf %7, %8 : vector<128x1xf32>
    %10 = vector.broadcast %9 : vector<128x1xf32> to vector<128x128xf32>
    %11 = arith.subf %3, %10 : vector<128x128xf32>
    %12 = arith.mulf %11, %11 : vector<128x128xf32>
    %cst_4 = arith.constant dense<0.000000e+00> : vector<128xf32>
    %13 = vector.multi_reduction <add>, %12, %cst_4 [1] : vector<128x128xf32> to vector<128xf32>
    %14 = vector.shape_cast %13 : vector<128xf32> to vector<128x1xf32>
    %cst_5 = arith.constant 0.00787401571 : f32
    %15 = vector.broadcast %cst_5 : f32 to vector<128x1xf32>
    %16 = arith.mulf %14, %15 : vector<128x1xf32>
    %17 = math.sqrt %16 : vector<128x1xf32>
    %c0_6 = arith.constant 0 : index
    %c0_7 = arith.constant 0 : index
    %18 = vector.load %arg5[%c0_6, %c0_7] : memref<128x1xf32, #tpu.memory_space<vmem>>, vector<128x1xf32>
    tpu.vector_store %arg5[%c0_6, %c0_7], %5 {strides = array<i32>} : memref<128x1xf32, #tpu.memory_space<vmem>>, vector<128x1xf32>,
    %cst_8 = arith.constant 9.99999997E-7 : f32
    %19 = vector.broadcast %cst_8 : f32 to vector<128x1xf32>
    %20 = arith.addf %17, %19 : vector<128x1xf32>
    %cst_9 = arith.constant 1.000000e+00 : f32
    %21 = vector.broadcast %cst_9 : f32 to vector<128x1xf32>
    %22 = arith.divf %21, %20 : vector<128x1xf32>
    %c0_10 = arith.constant 0 : index
    %c0_11 = arith.constant 0 : index
    %23 = vector.load %arg6[%c0_10, %c0_11] : memref<128x1xf32, #tpu.memory_space<vmem>>, vector<128x1xf32>
    tpu.vector_store %arg6[%c0_10, %c0_11], %22 {strides = array<i32>} : memref<128x1xf32, #tpu.memory_space<vmem>>, vector<128x1xf32>,
    %c0_12 = arith.constant 0 : index
    %c0_13 = arith.constant 0 : index
    %24 = vector.load %arg3[%c0_12, %c0_13] : memref<1x128xf32, #tpu.memory_space<vmem>>, vector<1x128xf32>
    %cst_14 = arith.constant dense<0.000000e+00> : vector<1x128xf32>
    %25 = tpu.matmul %24, %3, %cst_14 {dimension_numbers = #tpu.dot_dimension_numbers<[1], [0], [0], [1], [0, 0, 1, 1], [], []>} : vector<1x128xf32>, vector<128x128xf32>, vector<1x128xf32> -> vector<1x128xf32>
    %c0_15 = arith.constant 0 : index
    %c0_16 = arith.constant 0 : index
    %c0_17 = arith.constant 0 : index
    %26 = vector.load %arg4[%c0_15, %c0_16, %c0_17] : memref<1x1x128xf32, #tpu.memory_space<vmem>>, vector<1x1x128xf32>
    %27 = vector.shape_cast %25 : vector<1x128xf32> to vector<1x1x128xf32>
    %28 = arith.addf %26, %27 : vector<1x1x128xf32>
    %c0_18 = arith.constant 0 : index
    %c0_19 = arith.constant 0 : index
    %c0_20 = arith.constant 0 : index
    %29 = vector.load %arg4[%c0_18, %c0_19, %c0_20] : memref<1x1x128xf32, #tpu.memory_space<vmem>>, vector<1x1x128xf32>
    tpu.vector_store %arg4[%c0_18, %c0_19, %c0_20], %28 {strides = array<i32>} : memref<1x1x128xf32, #tpu.memory_space<vmem>>, vector<1x1x128xf32>,
    return
  }
  func.func @transform_0(%arg0: i32, %arg1: i32) -> (i32, i32) {
    %c1_i32 = arith.constant 1 : i32
    %0 = arith.muli %arg0, %c1_i32 : i32
    %1 = arith.addi %0, %arg1 : i32
    %c0_i32 = arith.constant 0 : i32
    %c0_i32_0 = arith.constant 0 : i32
    return %1, %c0_i32 : i32, i32
  }
  func.func @transform_1(%arg0: i32, %arg1: i32) -> (i32, i32) {
    %c1_i32 = arith.constant 1 : i32
    %0 = arith.muli %arg0, %c1_i32 : i32
    %1 = arith.addi %0, %arg1 : i32
    %c0_i32 = arith.constant 0 : i32
    %c0_i32_0 = arith.constant 0 : i32
    return %c0_i32, %1 : i32, i32
  }
  func.func @transform_2(%arg0: i32, %arg1: i32) -> (i32, i32, i32) {
    %c0_i32 = arith.constant 0 : i32
    %c0_i32_0 = arith.constant 0 : i32
    %c0_i32_1 = arith.constant 0 : i32
    return %arg0, %c0_i32, %c0_i32_0 : i32, i32, i32
  }
  func.func @transform_3(%arg0: i32, %arg1: i32) -> (i32, i32) {
    %c1_i32 = arith.constant 1 : i32
    %0 = arith.muli %arg0, %c1_i32 : i32
    %1 = arith.addi %0, %arg1 : i32
    %c0_i32 = arith.constant 0 : i32
    %c0_i32_0 = arith.constant 0 : i32
    return %1, %c0_i32 : i32, i32
  }
  func.func @transform_4(%arg0: i32, %arg1: i32) -> (i32, i32) {
    %c1_i32 = arith.constant 1 : i32
    %0 = arith.muli %arg0, %c1_i32 : i32
    %1 = arith.addi %0, %arg1 : i32
    %c0_i32 = arith.constant 0 : i32
    %c0_i32_0 = arith.constant 0 : i32
    return %1, %c0_i32 : i32, i32
  }
}

</mosaic_0001>

<bundles_post_ra>
// kernel: tpu_custom_call.1
= control target key start
LH: loop header
LB: loop body
LE: loop exit
PB: predicated region body
PF: predicated region fallthrough
CT: control target
= control target key end

     0   :  { %10 = vsyncpa [#allocation3], 0  ;;  %s1199_s0 = inlined_call_operand.hbm [shape: f32[128,128], index: 0, kind: input, shape index: {}]   ;;  %s1200_s1 = inlined_call_operand.vmem [shape: f32[1,128], index: 1, kind: input, shape index: {}]   ;;  %s1201_s2 = inlined_call_operand.hbm [shape: f32[1,1,128], index: 2, kind: output, shape index: {0}]   ;;  %s1202_s3 = inlined_call_operand.vmem [shape: f32[128,1], index: 3, kind: output, shape index: {1}]   ;;  %s1203_s4 = inlined_call_operand.vmem [shape: f32[128,1], index: 4, kind: output, shape index: {2}]  }
   0x1   :  { %11 = vsyncpa [#allocation4], 0  ;;  %s790_s15 = smov [#allocation2]   ;;  %s742_s19 = scalar_lea.hbm %s1199_s0, 2048 }
   0x2   :  { %s21_s16 = sshll.u32 %s790_s15, 4  ;;  %p743_p0 = scmp.ne.s32.totalorder %s1199_s0, %s742_s19  ;;  %s22_s16 = int_to_ptr.vmem [resolvable:$true] %s21_s16 }
   0x3   :  { %p746_p1 = scmp.lt.u32.totalorder %s742_s19, %s1199_s0 }
   0x5   :  { %p748_p2 = pnand %p746_p1, %p743_p0 }
   0x7   :  { %751 = shalt.err (!%p748_p2)
}
   0x8   :  { %s752_s24 = scalar_lea.vmem %s22_s16, 2048  ;;  %p757_p4 = scmp.lt.s32.totalorder %s22_s16, %s22_s16 }
   0x9   :  { %p753_p3 = scmp.ne.s32.totalorder %s22_s16, %s752_s24  ;;  %p758_p5 = scmp.lt.s32.totalorder %s752_s24, %s752_s24 }
   0xb   :  { %p759_p6 = por %p758_p5, %p757_p4 }
   0xd   :  { %p760_p7 = pnand %p759_p6, %p753_p3 }
   0xf   :  { %763 = shalt.err (!%p760_p7)
}
  0x10   :  { %s791_s25 = smov 128   ;;  %s792_s26 = smov 8  }
  0x11   :  { %27 = dma.hbm_to_vmem [thread:$0]  %s1199_s0, 2048, %s22_s16, [#allocation3], %s791_s25, %s791_s25, %s792_s26  }
  0x12   :  { %786 = dma.done.wait [#allocation3], 2048  }
  0x13   :  { %787 = vsyncadd [#allocation3], 4294965248  ;;  %v793_v0 = vmov 0.0|0.0   ;;  %v794_v1 = vmov 0.0   ;;  %vm795_vm0 = vmmov 0   ;;  %v834_v2 = vld [vmem:[#allocation2] sm:$0xff] }
  0x14   :  { %647 = vmatprep.subr.bf16.mxu0 %v793_v0  ;;  %81 = vst [vmem:[#allocation5] sm:$0x1] %v794_v1  ;;  %644 = vmatprep.mubr.msk.f32.mxu0 %vm795_vm0, %v794_v1  ;;  %v836_v3 = vld [vmem:[#allocation2 + $0x10] sm:$0xff]  ;;  %v838_v4 = vld [vmem:[#allocation2 + $0x8] sm:$0xff]  ;;  %v844_v6 = vld [vmem:[#allocation2 + $0x18] sm:$0xff] }
  0x15   :  { %130 = vadd.xlane.f32.xlu0 %v834_v2  ;;  %134 = vadd.xlane.f32.xlu1 %v836_v3  ;;  %v648_v5 = vpack.c.bf16 %v838_v4, %v834_v2  ;;  %v651_v7 = vpack.c.bf16 %v844_v6, %v836_v3  ;;  %v850_v8 = vld [vmem:[#allocation2 + $0x20] sm:$0xff]  ;;  %v852_v9 = vld [vmem:[#allocation2 + $0x28] sm:$0xff]  ;;  %v858_v11 = vld [vmem:[#allocation2 + $0x30] sm:$0xff] }
  0x16   :  { %v654_v10 = vpack.c.bf16 %v852_v9, %v850_v8  ;;  %v860_v12 = vld [vmem:[#allocation2 + $0x38] sm:$0xff]  ;;  %v866_v14 = vld [vmem:[#allocation2 + $0x40] sm:$0xff]  ;;  %v868_v15 = vld [vmem:[#allocation2 + $0x48] sm:$0xff] }
  0x17   :  { %649 = vmatpush3.bf16.msra.mxu0 %v648_v5  ;;  %v657_v13 = vpack.c.bf16 %v860_v12, %v858_v11  ;;  %v660_v16 = vpack.c.bf16 %v868_v15, %v866_v14  ;;  %v874_v17 = vld [vmem:[#allocation2 + $0x50] sm:$0xff]  ;;  %v876_v18 = vld [vmem:[#allocation2 + $0x58] sm:$0xff]  ;;  %v882_v20 = vld [vmem:[#allocation2 + $0x60] sm:$0xff] }
  0x18   :  { %650 = vmatprep.subr.bf16.mxu0 %v793_v0  ;;  %v663_v19 = vpack.c.bf16 %v876_v18, %v874_v17  ;;  %v884_v21 = vld [vmem:[#allocation2 + $0x68] sm:$0xff]  ;;  %v890_v23 = vld [vmem:[#allocation2 + $0x70] sm:$0xff]  ;;  %v892_v24 = vld [vmem:[#allocation2 + $0x78] sm:$0xff] }
  0x19   :  { %132 = vadd.xlane.f32.xlu0 %v838_v4  ;;  %136 = vadd.xlane.f32.xlu1 %v844_v6  ;;  %v666_v22 = vpack.c.bf16 %v884_v21, %v882_v20  ;;  %v669_v25 = vpack.c.bf16 %v892_v24, %v890_v23  ;;  %v451_v26 = vld [vmem:[%s1200_s1] sm:$0x1]  ;;  %s796_s1 = smov [#allocation5]  }
  0x1a   :  { %s543_s30 = sshll.u32 %s796_s1, 4  ;;  %s544_s30 = int_to_ptr.vmem [resolvable:$true] %s543_s30 }
  0x1b   :  { %652 = vmatpush3.bf16.msra.mxu0 %v651_v7  ;;  %s764_s5 = scalar_lea.vmem %s544_s30, 16  ;;  %s768_s6 = scalar_lea.vmem %s544_s30, 32 }
  0x1c   :  { %653 = vmatprep.subr.bf16.mxu0 %v793_v0  ;;  %p765_p8 = scmp.ne.s32.totalorder %s544_s30, %s764_s5  ;;  %p769_p9 = scmp.lt.s32.totalorder %s544_s30, %s544_s30 }
  0x1d   :  { %138 = vadd.xlane.f32.xlu0 %v850_v8  ;;  %140 = vadd.xlane.f32.xlu1 %v852_v9  ;;  %p770_p10 = scmp.lt.s32.totalorder %s768_s6, %s764_s5 }
  0x1f   :  { %655 = vmatpush3.bf16.msra.mxu0 %v654_v10  ;;  %p771_p11 = por %p770_p10, %p769_p9 }
  0x20   :  { %656 = vmatprep.subr.bf16.mxu0 %v793_v0 }
  0x21   :  { %142 = vadd.xlane.f32.xlu0 %v858_v11  ;;  %144 = vadd.xlane.f32.xlu1 %v860_v12  ;;  %p772_p12 = pnand %p771_p11, %p765_p8 }
  0x23   :  { %658 = vmatpush3.bf16.msra.mxu0 %v657_v13 }
  0x24   :  { %659 = vmatprep.subr.bf16.mxu0 %v793_v0 }
  0x25   :  { %146 = vadd.xlane.f32.xlu0 %v866_v14  ;;  %148 = vadd.xlane.f32.xlu1 %v868_v15 }
  0x27   :  { %661 = vmatpush3.bf16.msra.mxu0 %v660_v16 }
  0x28   :  { %662 = vmatprep.subr.bf16.mxu0 %v793_v0 }
  0x29   :  { %150 = vadd.xlane.f32.xlu0 %v874_v17  ;;  %152 = vadd.xlane.f32.xlu1 %v876_v18 }
  0x2b   :  { %664 = vmatpush3.bf16.msra.mxu0 %v663_v19 }
  0x2c   :  { %665 = vmatprep.subr.bf16.mxu0 %v793_v0 }
  0x2d   :  { %154 = vadd.xlane.f32.xlu0 %v882_v20  ;;  %156 = vadd.xlane.f32.xlu1 %v884_v21 }
  0x2f   :  { %667 = vmatpush3.bf16.msra.mxu0 %v666_v22 }
  0x30   :  { %668 = vmatprep.subr.bf16.mxu0 %v793_v0 }
  0x31   :  { %158 = vadd.xlane.f32.xlu0 %v890_v23  ;;  %160 = vadd.xlane.f32.xlu1 %v892_v24 }
  0x33   :  { %670 = vmatpush3.bf16.msra.mxu0 %v669_v25 }
  0x36   :  { %645 = vmatmul.mubr.f32.vlgmr.msra.gmra.mrb[0].mxu0 %v451_v26 }
  0xa2   :  { %v131_v27 = vpop.xlane.xlu0 %130  ;;  %v135_v28 = vpop.xlane.xlu1 %134 }
  0xa3   :  { %v162_v29 = vmul.f32 0.0078125, %v131_v27  ;;  %v164_v30 = vmul.f32 0.0078125, %v135_v28 }
  0xa5   :  { %v178_v31 = vsub.f32 %v834_v2, %v162_v29  ;;  %v180_v32 = vsub.f32 %v836_v3, %v164_v30 }
  0xa6   :  { %v133_v33 = vpop.xlane.xlu0 %132  ;;  %v137_v34 = vpop.xlane.xlu1 %136 }
  0xa7   :  { %v163_v35 = vmul.f32 0.0078125, %v133_v33  ;;  %v194_v36 = vmul.f32 %v178_v31, %v178_v31  ;;  %v165_v37 = vmul.f32 0.0078125, %v137_v34  ;;  %v196_v38 = vmul.f32 %v180_v32, %v180_v32 }
  0xa9   :  { %210 = vadd.xlane.f32.xlu0 %v194_v36  ;;  %v179_v39 = vsub.f32 %v838_v4, %v163_v35  ;;  %v181_v40 = vsub.f32 %v844_v6, %v165_v37 }
  0xaa   :  { %v139_v41 = vpop.xlane.xlu0 %138  ;;  %v141_v42 = vpop.xlane.xlu1 %140 }
  0xab   :  { %v166_v43 = vmul.f32 0.0078125, %v139_v41  ;;  %v195_v44 = vmul.f32 %v179_v39, %v179_v39  ;;  %v167_v45 = vmul.f32 0.0078125, %v141_v42  ;;  %v197_v46 = vmul.f32 %v181_v40, %v181_v40 }
  0xad   :  { %214 = vadd.xlane.f32.xlu0 %v196_v38  ;;  %212 = vadd.xlane.f32.xlu1 %v195_v44  ;;  %v182_v47 = vsub.f32 %v850_v8, %v166_v43  ;;  %v183_v48 = vsub.f32 %v852_v9, %v167_v45 }
  0xae   :  { %v143_v49 = vpop.xlane.xlu0 %142  ;;  %v145_v50 = vpop.xlane.xlu1 %144 }
  0xaf   :  { %v168_v51 = vmul.f32 0.0078125, %v143_v49  ;;  %v198_v52 = vmul.f32 %v182_v47, %v182_v47  ;;  %v169_v53 = vmul.f32 0.0078125, %v145_v50  ;;  %v199_v54 = vmul.f32 %v183_v48, %v183_v48 }
  0xb1   :  { %216 = vadd.xlane.f32.xlu1 %v197_v46  ;;  %218 = vadd.xlane.f32.xlu0 %v198_v52  ;;  %v184_v55 = vsub.f32 %v858_v11, %v168_v51  ;;  %v185_v56 = vsub.f32 %v860_v12, %v169_v53 }
  0xb2   :  { %v147_v57 = vpop.xlane.xlu0 %146  ;;  %v149_v58 = vpop.xlane.xlu1 %148 }
  0xb3   :  { %v170_v59 = vmul.f32 0.0078125, %v147_v57  ;;  %v200_v60 = vmul.f32 %v184_v55, %v184_v55  ;;  %v171_v61 = vmul.f32 0.0078125, %v149_v58  ;;  %v201_v62 = vmul.f32 %v185_v56, %v185_v56 }
  0xb5   :  { %220 = vadd.xlane.f32.xlu1 %v199_v54  ;;  %222 = vadd.xlane.f32.xlu0 %v200_v60  ;;  %v186_v63 = vsub.f32 %v866_v14, %v170_v59  ;;  %v187_v0 = vsub.f32 %v868_v15, %v171_v61 }
  0xb6   :  { %v151_v1 = vpop.xlane.xlu0 %150  ;;  %v153_v5 = vpop.xlane.xlu1 %152 }
  0xb7   :  { %v172_v7 = vmul.f32 0.0078125, %v151_v1  ;;  %v202_v10 = vmul.f32 %v186_v63, %v186_v63  ;;  %v173_v13 = vmul.f32 0.0078125, %v153_v5  ;;  %v203_v16 = vmul.f32 %v187_v0, %v187_v0 }
  0xb9   :  { %224 = vadd.xlane.f32.xlu1 %v201_v62  ;;  %226 = vadd.xlane.f32.xlu0 %v202_v10  ;;  %v188_v19 = vsub.f32 %v874_v17, %v172_v7  ;;  %v189_v22 = vsub.f32 %v876_v18, %v173_v13 }
  0xba   :  { %v155_v25 = vpop.xlane.xlu0 %154  ;;  %v157_v26 = vpop.xlane.xlu1 %156 }
  0xbb   :  { %v174_v27 = vmul.f32 0.0078125, %v155_v25  ;;  %v204_v28 = vmul.f32 %v188_v19, %v188_v19  ;;  %v175_v29 = vmul.f32 0.0078125, %v157_v26  ;;  %v205_v30 = vmul.f32 %v189_v22, %v189_v22 }
  0xbd   :  { %228 = vadd.xlane.f32.xlu1 %v203_v16  ;;  %230 = vadd.xlane.f32.xlu0 %v204_v28  ;;  %v190_v31 = vsub.f32 %v882_v20, %v174_v27  ;;  %v191_v32 = vsub.f32 %v884_v21, %v175_v29 }
  0xbe   :  { %v159_v33 = vpop.xlane.xlu0 %158  ;;  %v161_v34 = vpop.xlane.xlu1 %160 }
  0xbf   :  { %v176_v35 = vmul.f32 0.0078125, %v159_v33  ;;  %v206_v36 = vmul.f32 %v190_v31, %v190_v31  ;;  %v177_v37 = vmul.f32 0.0078125, %v161_v34  ;;  %v207_v38 = vmul.f32 %v191_v32, %v191_v32 }
  0xc1   :  { %232 = vadd.xlane.f32.xlu1 %v205_v30  ;;  %234 = vadd.xlane.f32.xlu0 %v206_v36  ;;  %v192_v39 = vsub.f32 %v890_v23, %v176_v35  ;;  %v193_v40 = vsub.f32 %v892_v24, %v177_v37 }
  0xc3   :  { %v208_v41 = vmul.f32 %v192_v39, %v192_v39  ;;  %v209_v42 = vmul.f32 %v193_v40, %v193_v40 }
  0xc5   :  { %236 = vadd.xlane.f32.xlu1 %v207_v38  ;;  %238 = vadd.xlane.f32.xlu0 %v208_v41 }
  0xc9   :  { %240 = vadd.xlane.f32.xlu1 %v209_v42  ;;  %98 = vmin.xlane.f32.xlu0 %v834_v2  ;;  %v522_v2 = vld [vmem:[#allocation5] sm:$0x1] }
  0xcd   :  { %100 = vmin.xlane.f32.xlu1 %v838_v4  ;;  %102 = vmin.xlane.f32.xlu0 %v836_v3 }
  0xd1   :  { %104 = vmin.xlane.f32.xlu1 %v844_v6  ;;  %106 = vmin.xlane.f32.xlu0 %v850_v8 }
  0xd5   :  { %108 = vmin.xlane.f32.xlu1 %v852_v9  ;;  %110 = vmin.xlane.f32.xlu0 %v858_v11 }
  0xd9   :  { %112 = vmin.xlane.f32.xlu1 %v860_v12  ;;  %114 = vmin.xlane.f32.xlu0 %v866_v14 }
  0xdd   :  { %116 = vmin.xlane.f32.xlu1 %v868_v15  ;;  %118 = vmin.xlane.f32.xlu0 %v874_v17 }
  0xe1   :  { %120 = vmin.xlane.f32.xlu1 %v876_v18  ;;  %122 = vmin.xlane.f32.xlu0 %v882_v20 }
  0xe5   :  { %124 = vmin.xlane.f32.xlu1 %v884_v21  ;;  %126 = vmin.xlane.f32.xlu0 %v890_v23 }
  0xe9   :  { %128 = vmin.xlane.f32.xlu1 %v892_v24 }
 0x109   :  { %v518_v3 = vpop.f32.mrb[0].mxu0 }
 0x10a   :  { %v523_v4 = vadd.f32 %v522_v2, %v518_v3  ;;  %v646_v6 = vpop.f32.mrb[1].mxu0 }
 0x10c   :  { %524 = vst [vmem:[#allocation5] sm:$0x1] %v523_v4 }
 0x10d   :  { %775 = shalt.err (!%p772_p12)
}
 0x10e   :  { %s776_s9 = scalar_lea.hbm %s1201_s2, 16 }
 0x10f   :  { %p777_p13 = scmp.ne.s32.totalorder %s1201_s2, %s776_s9  ;;  %p780_p0 = scmp.lt.u32.totalorder %s776_s9, %s1201_s2 }
 0x111   :  { %p782_p1 = pnand %p780_p0, %p777_p13 }
 0x113   :  { %785 = shalt.err (!%p782_p1)
}
 0x114   :  { %546 = dma.vmem_to_hbm [thread:$0]  %s544_s30, 16, %s1201_s2, [#allocation4]   ;;  %vm370_vm9 = vcmask 7168  }
 0x136   :  { %v211_v8 = vpop.xlane.xlu0 %210 }
 0x137   :  { %v242_v9 = vmul.f32 0.007874016, %v211_v8 }
 0x139   :  { %678 = vrsqrt.f32 %v242_v9  ;;  %vm260_vm1 = vcmp.eq.f32.partialorder %v242_v9, inf  ;;  %vm262_vm2 = vcmp.eq.f32.partialorder %v242_v9, 0.0  ;;  %v263_v47 = vand.u32 2147483648, %v242_v9 }
 0x13a   :  { %v213_v11 = vpop.xlane.xlu1 %212  ;;  %v215_v12 = vpop.xlane.xlu0 %214 }
 0x13b   :  { %v243_v14 = vmul.f32 0.007874016, %v213_v11  ;;  %v244_v15 = vmul.f32 0.007874016, %v215_v12 }
 0x13d   :  { %680 = vrsqrt.f32 %v243_v14  ;;  %vm267_vm3 = vcmp.eq.f32.partialorder %v243_v14, inf  ;;  %vm269_vm4 = vcmp.eq.f32.partialorder %v243_v14, 0.0  ;;  %v270_v49 = vand.u32 2147483648, %v243_v14 }
 0x13e   :  { %682 = vrsqrt.f32 %v244_v15  ;;  %v217_v17 = vpop.xlane.xlu1 %216  ;;  %v219_v18 = vpop.xlane.xlu0 %218  ;;  %vm274_vm5 = vcmp.eq.f32.partialorder %v244_v15, inf  ;;  %vm276_vm6 = vcmp.eq.f32.partialorder %v244_v15, 0.0  ;;  %v277_v59 = vand.u32 2147483648, %v244_v15 }
 0x13f   :  { %v945_v20 = vmul.f32 0.007874016, %v217_v17  ;;  %v947_v21 = vmul.f32 0.007874016, %v219_v18 }
 0x141   :  { %684 = vrsqrt.f32 %v945_v20  ;;  %vm281_vm7 = vcmp.eq.f32.partialorder %v945_v20, inf  ;;  %vm283_vm8 = vcmp.eq.f32.partialorder %v945_v20, 0.0  ;;  %v284_v61 = vand.u32 2147483648, %v945_v20 }
 0x142   :  { %686 = vrsqrt.f32 %v947_v21  ;;  %v221_v23 = vpop.xlane.xlu1 %220  ;;  %v223_v24 = vpop.xlane.xlu0 %222  ;;  %vm288_vm10 = vcmp.eq.f32.partialorder %v947_v21, inf  ;;  %vm290_vm11 = vcmp.eq.f32.partialorder %v947_v21, 0.0  ;;  %v291_v10 = vand.u32 2147483648, %v947_v21 }
 0x143   :  { %v679_v43 = vpop.eup %678  ;;  %v951_v44 = vmul.f32 0.007874016, %v221_v23  ;;  %v953_v45 = vmul.f32 0.007874016, %v223_v24 }
 0x144   :  { %v259_v46 = vmul.f32 %v679_v43, %v242_v9 }
 0x145   :  { %688 = vrsqrt.f32 %v951_v44  ;;  %vm295_vm12 = vcmp.eq.f32.partialorder %v951_v44, inf  ;;  %vm297_vm13 = vcmp.eq.f32.partialorder %v951_v44, 0.0  ;;  %v298_v29 = vand.u32 2147483648, %v951_v44 }
 0x146   :  { %v261_v48 = vsel %vm260_vm1, %v242_v9, %v259_v46  ;;  %690 = vrsqrt.f32 %v953_v45  ;;  %v225_v50 = vpop.xlane.xlu1 %224  ;;  %v227_v51 = vpop.xlane.xlu0 %226  ;;  %vm302_vm14 = vcmp.eq.f32.partialorder %v953_v45, inf  ;;  %vm304_vm15 = vcmp.eq.f32.partialorder %v953_v45, 0.0 }
 0x147   :  { %v681_v52 = vpop.eup %680  ;;  %v264_v53 = vsel %vm262_vm2, %v263_v47, %v261_v48  ;;  %v957_v54 = vmul.f32 0.007874016, %v225_v50  ;;  %v959_v55 = vmul.f32 0.007874016, %v227_v51  ;;  %v305_v42 = vand.u32 2147483648, %v953_v45 }
 0x148   :  { %v683_v56 = vpop.eup %682  ;;  %v387_v57 = vadd.f32 1e-06, %v264_v53  ;;  %v266_v58 = vmul.f32 %v681_v52, %v243_v14 }
 0x149   :  { %v273_v60 = vmul.f32 %v683_v56, %v244_v15  ;;  %692 = vrsqrt.f32 %v957_v54  ;;  %vm309_vm0 = vcmp.eq.f32.partialorder %v957_v54, inf  ;;  %vm311_vm1 = vcmp.eq.f32.partialorder %v957_v54, 0.0 }
 0x14a   :  { %694 = vrcp.f32 %v387_v57  ;;  %v268_v62 = vsel %vm267_vm3, %v243_v14, %v266_v58  ;;  %v229_v63 = vpop.xlane.xlu1 %228  ;;  %v231_v0 = vpop.xlane.xlu0 %230  ;;  %v312_v11 = vand.u32 2147483648, %v957_v54  ;;  %vm316_vm2 = vcmp.eq.f32.partialorder %v959_v55, inf }
 0x14b   :  { %v685_v1 = vpop.eup %684  ;;  %v271_v5 = vsel %vm269_vm4, %v270_v49, %v268_v62  ;;  %v275_v7 = vsel %vm274_vm5, %v244_v15, %v273_v60  ;;  %696 = vrsqrt.f32 %v959_v55  ;;  %v977_v27 = vmul.f32 0.007874016, %v229_v63 }
 0x14c   :  { %v687_v13 = vpop.eup %686  ;;  %v388_v16 = vadd.f32 1e-06, %v271_v5  ;;  %v278_v19 = vsel %vm276_vm6, %v277_v59, %v275_v7  ;;  %v280_v22 = vmul.f32 %v685_v1, %v945_v20  ;;  %v989_v35 = vmul.f32 0.007874016, %v231_v0 }
 0x14d   :  { %v389_v25 = vadd.f32 1e-06, %v278_v19  ;;  %v287_v26 = vmul.f32 %v687_v13, %v947_v21  ;;  %v319_v47 = vand.u32 2147483648, %v959_v55  ;;  %vm318_vm3 = vcmp.eq.f32.partialorder %v959_v55, 0.0 }
 0x14e   :  { %698 = vrcp.f32 %v388_v16  ;;  %v282_v28 = vsel %vm281_vm7, %v945_v20, %v280_v22  ;;  %v233_v30 = vpop.xlane.xlu1 %232  ;;  %v235_v31 = vpop.xlane.xlu0 %234  ;;  %vm323_vm4 = vcmp.eq.f32.partialorder %v977_v27, inf  ;;  %v326_v60 = vand.u32 2147483648, %v977_v27 }
 0x14f   :  { %v689_v32 = vpop.eup %688  ;;  %700 = vrcp.f32 %v389_v25  ;;  %v285_v33 = vsel %vm283_vm8, %v284_v61, %v282_v28  ;;  %v289_v34 = vsel %vm288_vm10, %v947_v21, %v287_v26  ;;  %v1015_v21 = vmul.f32 0.007874016, %v233_v30 }
 0x150   :  { %v691_v36 = vpop.eup %690  ;;  %v390_v37 = vadd.f32 1e-06, %v285_v33  ;;  %v292_v38 = vsel %vm290_vm11, %v291_v10, %v289_v34  ;;  %v294_v39 = vmul.f32 %v689_v32, %v951_v44  ;;  %702 = vrsqrt.f32 %v977_v27 }
 0x151   :  { %v391_v40 = vadd.f32 1e-06, %v292_v38  ;;  %v301_v41 = vmul.f32 %v691_v36, %v953_v45  ;;  %v1017_v23 = vmul.f32 0.007874016, %v235_v31  ;;  %vm325_vm5 = vcmp.eq.f32.partialorder %v977_v27, 0.0 }
 0x152   :  { %704 = vrcp.f32 %v390_v37  ;;  %v296_v2 = vsel %vm295_vm12, %v951_v44, %v294_v39  ;;  %v237_v3 = vpop.xlane.xlu1 %236  ;;  %v239_v4 = vpop.xlane.xlu0 %238  ;;  %vm330_vm6 = vcmp.eq.f32.partialorder %v989_v35, inf  ;;  %v333_v22 = vand.u32 2147483648, %v989_v35 }
 0x153   :  { %v693_v6 = vpop.eup %692  ;;  %706 = vrcp.f32 %v391_v40  ;;  %v299_v8 = vsel %vm297_vm13, %v298_v29, %v296_v2  ;;  %v303_v9 = vsel %vm302_vm14, %v953_v45, %v301_v41  ;;  %v1027_v48 = vmul.f32 0.007874016, %v237_v3 }
 0x154   :  { %v695_v12 = vpop.eup %694  ;;  %v392_v14 = vadd.f32 1e-06, %v299_v8  ;;  %v306_v15 = vsel %vm304_vm15, %v305_v42, %v303_v9  ;;  %v308_v17 = vmul.f32 %v693_v6, %v957_v54  ;;  %708 = vrsqrt.f32 %v989_v35 }
 0x155   :  { %v697_v18 = vpop.eup %696  ;;  %435 = vst.msk [vmem:[%s1203_s4] sm:$0xff] %vm370_vm9, %v695_v12  ;;  %v393_v20 = vadd.f32 1e-06, %v306_v15  ;;  %v1057_v61 = vmul.f32 0.007874016, %v239_v4  ;;  %vm332_vm7 = vcmp.eq.f32.partialorder %v989_v35, 0.0 }
 0x156   :  { %710 = vrcp.f32 %v392_v14  ;;  %v310_v24 = vsel %vm309_vm0, %v957_v54, %v308_v17  ;;  %v315_v43 = vmul.f32 %v697_v18, %v959_v55  ;;  %v241_v44 = vpop.xlane.xlu1 %240  ;;  %v99_v45 = vpop.xlane.xlu0 %98  ;;  %vm337_vm8 = vcmp.eq.f32.partialorder %v1015_v21, inf }
 0x157   :  { %712 = vrcp.f32 %v393_v20  ;;  %v313_v46 = vsel %vm311_vm1, %v312_v11, %v310_v24  ;;  %371 = vst.msk [vmem:[%s1202_s3] sm:$0xff] %vm370_vm9, %v99_v45  ;;  %v1059_v62 = vmul.f32 0.007874016, %v241_v44  ;;  %vm339_vm10 = vcmp.eq.f32.partialorder %v1015_v21, 0.0 }
 0x158   :  { %v699_v49 = vpop.eup %698  ;;  %v394_v50 = vadd.f32 1e-06, %v313_v46  ;;  %v317_v51 = vsel %vm316_vm2, %v959_v55, %v315_v43  ;;  %714 = vrsqrt.f32 %v1015_v21  ;;  %vm344_vm11 = vcmp.eq.f32.partialorder %v1017_v23, inf }
 0x159   :  { %v701_v52 = vpop.eup %700  ;;  %436 = vst.msk [vmem:[%s1203_s4 + $0x8] sm:$0xff] %vm370_vm9, %v699_v49  ;;  %v320_v53 = vsel %vm318_vm3, %v319_v47, %v317_v51  ;;  %716 = vrsqrt.f32 %v1017_v23  ;;  %v347_v39 = vand.u32 2147483648, %v1017_v23  ;;  %vm346_vm12 = vcmp.eq.f32.partialorder %v1017_v23, 0.0 }
 0x15a   :  { %v703_v54 = vpop.eup %702  ;;  %437 = vst.msk [vmem:[%s1203_s4 + $0x10] sm:$0xff] %vm370_vm9, %v701_v52  ;;  %718 = vrcp.f32 %v394_v50  ;;  %v395_v56 = vadd.f32 1e-06, %v320_v53  ;;  %v101_v55 = vpop.xlane.xlu1 %100  ;;  %vm351_vm13 = vcmp.eq.f32.partialorder %v1027_v48, inf  ;;  %v354_v9 = vand.u32 2147483648, %v1027_v48 }
 0x15b   :  { %v103_v57 = vpop.xlane.xlu0 %102  ;;  %v322_v58 = vmul.f32 %v703_v54, %v977_v27  ;;  %720 = vrsqrt.f32 %v1027_v48  ;;  %372 = vst.msk [vmem:[%s1202_s3 + $0x8] sm:$0xff] %vm370_vm9, %v101_v55  ;;  %vm353_vm14 = vcmp.eq.f32.partialorder %v1027_v48, 0.0  ;;  %vm358_vm15 = vcmp.eq.f32.partialorder %v1057_v61, inf }
 0x15c   :  { %373 = vst.msk [vmem:[%s1202_s3 + $0x10] sm:$0xff] %vm370_vm9, %v103_v57  ;;  %v705_v59 = vpop.eup %704  ;;  %722 = vrcp.f32 %v395_v56  ;;  %vm360_vm0 = vcmp.eq.f32.partialorder %v1057_v61, 0.0  ;;  %vm365_vm1 = vcmp.eq.f32.partialorder %v1059_v62, inf  ;;  %v368_v46 = vand.u32 2147483648, %v1059_v62 }
 0x15d   :  { %v707_v63 = vpop.eup %706  ;;  %438 = vst.msk [vmem:[%s1203_s4 + $0x18] sm:$0xff] %vm370_vm9, %v705_v59  ;;  %v324_v0 = vsel %vm323_vm4, %v977_v27, %v322_v58  ;;  %724 = vrsqrt.f32 %v1057_v61  ;;  %vm367_vm2 = vcmp.eq.f32.partialorder %v1059_v62, 0.0 }
 0x15e   :  { %v709_v1 = vpop.eup %708  ;;  %439 = vst.msk [vmem:[%s1203_s4 + $0x20] sm:$0xff] %vm370_vm9, %v707_v63  ;;  %v327_v5 = vsel %vm325_vm5, %v326_v60, %v324_v0  ;;  %v105_v7 = vpop.xlane.xlu1 %104  ;;  %726 = vrsqrt.f32 %v1059_v62 }
 0x15f   :  { %v107_v10 = vpop.xlane.xlu0 %106  ;;  %v396_v13 = vadd.f32 1e-06, %v327_v5  ;;  %v329_v16 = vmul.f32 %v709_v1, %v989_v35  ;;  %374 = vst.msk [vmem:[%s1202_s3 + $0x18] sm:$0xff] %vm370_vm9, %v105_v7 }
 0x160   :  { %375 = vst.msk [vmem:[%s1202_s3 + $0x20] sm:$0xff] %vm370_vm9, %v107_v10  ;;  %v711_v19 = vpop.eup %710 }
 0x161   :  { %v713_v25 = vpop.eup %712  ;;  %440 = vst.msk [vmem:[%s1203_s4 + $0x28] sm:$0xff] %vm370_vm9, %v711_v19  ;;  %728 = vrcp.f32 %v396_v13  ;;  %v331_v26 = vsel %vm330_vm6, %v989_v35, %v329_v16  ;;  %v340_v35 = vand.u32 2147483648, %v1015_v21 }
 0x162   :  { %v715_v27 = vpop.eup %714  ;;  %441 = vst.msk [vmem:[%s1203_s4 + $0x30] sm:$0xff] %vm370_vm9, %v713_v25  ;;  %v334_v28 = vsel %vm332_vm7, %v333_v22, %v331_v26  ;;  %v109_v29 = vpop.xlane.xlu1 %108 }
 0x163   :  { %v111_v30 = vpop.xlane.xlu0 %110  ;;  %v717_v31 = vpop.eup %716  ;;  %v397_v32 = vadd.f32 1e-06, %v334_v28  ;;  %v336_v33 = vmul.f32 %v715_v27, %v1015_v21  ;;  %376 = vst.msk [vmem:[%s1202_s3 + $0x28] sm:$0xff] %vm370_vm9, %v109_v29 }
 0x164   :  { %377 = vst.msk [vmem:[%s1202_s3 + $0x30] sm:$0xff] %vm370_vm9, %v111_v30  ;;  %v719_v34 = vpop.eup %718  ;;  %v343_v36 = vmul.f32 %v717_v31, %v1017_v23 }
 0x165   :  { %v721_v37 = vpop.eup %720  ;;  %442 = vst.msk [vmem:[%s1203_s4 + $0x38] sm:$0xff] %vm370_vm9, %v719_v34  ;;  %730 = vrcp.f32 %v397_v32  ;;  %v338_v38 = vsel %vm337_vm8, %v1015_v21, %v336_v33  ;;  %v361_v21 = vand.u32 2147483648, %v1057_v61 }
 0x166   :  { %v723_v40 = vpop.eup %722  ;;  %v341_v41 = vsel %vm339_vm10, %v340_v35, %v338_v38  ;;  %v345_v42 = vsel %vm344_vm11, %v1017_v23, %v343_v36  ;;  %v350_v2 = vmul.f32 %v721_v37, %v1027_v48  ;;  %v113_v3 = vpop.xlane.xlu1 %112 }
 0x167   :  { %v115_v4 = vpop.xlane.xlu0 %114  ;;  %443 = vst.msk [vmem:[%s1203_s4 + $0x40] sm:$0xff] %vm370_vm9, %v723_v40  ;;  %v398_v6 = vadd.f32 1e-06, %v341_v41  ;;  %v348_v8 = vsel %vm346_vm12, %v347_v39, %v345_v42  ;;  %378 = vst.msk [vmem:[%s1202_s3 + $0x38] sm:$0xff] %vm370_vm9, %v113_v3  ;;  %v725_v11 = vpop.eup %724 }
 0x168   :  { %379 = vst.msk [vmem:[%s1202_s3 + $0x40] sm:$0xff] %vm370_vm9, %v115_v4  ;;  %v399_v12 = vadd.f32 1e-06, %v348_v8  ;;  %v352_v14 = vsel %vm351_vm13, %v1027_v48, %v350_v2  ;;  %v727_v15 = vpop.eup %726  ;;  %v357_v18 = vmul.f32 %v725_v11, %v1057_v61 }
 0x169   :  { %732 = vrcp.f32 %v398_v6  ;;  %v355_v17 = vsel %vm353_vm14, %v354_v9, %v352_v14  ;;  %v364_v23 = vmul.f32 %v727_v15, %v1059_v62 }
 0x16a   :  { %734 = vrcp.f32 %v399_v12  ;;  %v400_v20 = vadd.f32 1e-06, %v355_v17  ;;  %v117_v24 = vpop.xlane.xlu1 %116  ;;  %v359_v45 = vsel %vm358_vm15, %v1057_v61, %v357_v18 }
 0x16b   :  { %v119_v43 = vpop.xlane.xlu0 %118  ;;  %v729_v44 = vpop.eup %728  ;;  %380 = vst.msk [vmem:[%s1202_s3 + $0x48] sm:$0xff] %vm370_vm9, %v117_v24  ;;  %v362_v47 = vsel %vm360_vm0, %v361_v21, %v359_v45  ;;  %v366_v48 = vsel %vm365_vm1, %v1059_v62, %v364_v23 }
 0x16c   :  { %381 = vst.msk [vmem:[%s1202_s3 + $0x50] sm:$0xff] %vm370_vm9, %v119_v43  ;;  %444 = vst.msk [vmem:[%s1203_s4 + $0x48] sm:$0xff] %vm370_vm9, %v729_v44  ;;  %736 = vrcp.f32 %v400_v20  ;;  %v401_v49 = vadd.f32 1e-06, %v362_v47  ;;  %v369_v50 = vsel %vm367_vm2, %v368_v46, %v366_v48 }
 0x16d   :  { %v402_v51 = vadd.f32 1e-06, %v369_v50 }
 0x16e   :  { %v121_v52 = vpop.xlane.xlu1 %120  ;;  %738 = vrcp.f32 %v401_v49 }
 0x16f   :  { %v123_v53 = vpop.xlane.xlu0 %122  ;;  %v731_v54 = vpop.eup %730  ;;  %382 = vst.msk [vmem:[%s1202_s3 + $0x58] sm:$0xff] %vm370_vm9, %v121_v52  ;;  %740 = vrcp.f32 %v402_v51 }
 0x170   :  { %383 = vst.msk [vmem:[%s1202_s3 + $0x60] sm:$0xff] %vm370_vm9, %v123_v53  ;;  %445 = vst.msk [vmem:[%s1203_s4 + $0x50] sm:$0xff] %vm370_vm9, %v731_v54 }
 0x172   :  { %v125_v56 = vpop.xlane.xlu1 %124 }
 0x173   :  { %v127_v55 = vpop.xlane.xlu0 %126  ;;  %v733_v57 = vpop.eup %732  ;;  %384 = vst.msk [vmem:[%s1202_s3 + $0x68] sm:$0xff] %vm370_vm9, %v125_v56 }
 0x174   :  { %385 = vst.msk [vmem:[%s1202_s3 + $0x70] sm:$0xff] %vm370_vm9, %v127_v55  ;;  %v735_v58 = vpop.eup %734  ;;  %446 = vst.msk [vmem:[%s1203_s4 + $0x58] sm:$0xff] %vm370_vm9, %v733_v57 }
 0x175   :  { %447 = vst.msk [vmem:[%s1203_s4 + $0x60] sm:$0xff] %vm370_vm9, %v735_v58 }
 0x176   :  { %v737_v59 = vpop.eup %736  ;;  %v129_v60 = vpop.xlane.xlu1 %128 }
 0x177   :  { %448 = vst.msk [vmem:[%s1203_s4 + $0x68] sm:$0xff] %vm370_vm9, %v737_v59  ;;  %386 = vst.msk [vmem:[%s1202_s3 + $0x78] sm:$0xff] %vm370_vm9, %v129_v60 }
 0x178   :  { %v739_v61 = vpop.eup %738 }
 0x179   :  { %v741_v62 = vpop.eup %740  ;;  %449 = vst.msk [vmem:[%s1203_s4 + $0x70] sm:$0xff] %vm370_vm9, %v739_v61 }
 0x17a   :  { %450 = vst.msk [vmem:[%s1203_s4 + $0x78] sm:$0xff] %vm370_vm9, %v741_v62 }
 0x17b   :  { %788 = dma.done.wait [#allocation4], 16  }
 0x17c   :  { %789 = vsyncadd [#allocation4], 4294967280 }
 0x17d   :  { %574 = vsyncpa [#allocation3], 1 }
 0x17e   :  { %575 = vsyncpa [#allocation4], 1 }

</bundles_post_ra>
